<compile_context>
chip_gen: v7x
topology: tpu7x:2x2x1
jax: 0.10.0
libtpu: 0.0.40
codegen_flags: <defaults>
</compile_context>

<pallas_src>
import functools

import numpy as np
import jax
import jax.numpy as jnp
from jax.experimental import pallas as pl
from jax.experimental.pallas import tpu as pltpu


def _make_att_kernel(loss_type: str):
    """Build the attribute-loss kernel with loss_type baked in at trace time."""

    if loss_type == "bce":

        def kernel(logits_ref, tgt_ref, mask_ref, out_ref):
            x = logits_ref[...]                      # [N, C] f32 logits
            z = tgt_ref[...]                         # [N, C] f32 targets in {0,1}
            m = mask_ref[...]                        # [1, C] f32 fed-loss class mask
            # Stable BCE-with-logits: max(x,0) - x*z + log(1 + exp(-|x|))
            # -> exactly one exp + one log per element (EUP-friendly).
            e = jnp.exp(-jnp.abs(x))
            bce = jnp.maximum(x, 0.0) - x * z + jnp.log(1.0 + e)
            total = jnp.sum(bce * m)                 # [1,C] mask broadcasts over rows
            k = jnp.sum(m)                           # number of sampled classes
            n_rows = float(x.shape[0])
            out_ref[0] = total / (k * n_rows)        # mean over [N, |inds|]

    else:  # 'focal': CornerNet-style _neg_loss on sigmoid(logits); no class subset.

        def kernel(logits_ref, tgt_ref, out_ref):
            x = logits_ref[...]                      # [N, C]
            z = tgt_ref[...]                         # [N, C] in {0,1}
            # Shared transcendentals: one exp + one log give both log-sigmoids,
            # one extra exp recovers p = sigmoid(x).  Stable for large |x|.
            e = jnp.exp(-jnp.abs(x))
            l1p = jnp.log(1.0 + e)
            log_p = -(jnp.maximum(-x, 0.0) + l1p)    # log sigmoid(x)
            log_1mp = -(jnp.maximum(x, 0.0) + l1p)   # log(1 - sigmoid(x))
            p = jnp.exp(log_p)
            pos = (z == 1.0).astype(jnp.float32)
            neg = (z < 1.0).astype(jnp.float32)
            pos_loss = jnp.sum(log_p * jnp.square(1.0 - p) * pos)
            neg_loss = jnp.sum(log_1mp * jnp.square(p) * neg)
            num_pos = jnp.sum(pos)
            loss = jnp.where(num_pos == 0.0, -neg_loss,
                             -(pos_loss + neg_loss) / jnp.maximum(num_pos, 1.0))
            out_ref[0] = loss

    return kernel


@functools.partial(jax.jit, static_argnames=("loss_type",))
def _att_loss_device(logits, target_classes, ind_mask, *, loss_type):
    kernel = _make_att_kernel(loss_type)
    if loss_type == "bce":
        args = (logits, target_classes, ind_mask)
    else:
        args = (logits, target_classes)
    # Inputs are small ([N, C] with C lane-aligned); a single whole-array VMEM
    # block is well under any generation's VMEM budget, so no grid is needed.
    res = pl.pallas_call(
        kernel,
        out_shape=jax.ShapeDtypeStruct((1,), jnp.float32),
        in_specs=[pl.BlockSpec(memory_space=pltpu.MemorySpace.VMEM)] * len(args),
        out_specs=pl.BlockSpec(memory_space=pltpu.MemorySpace.SMEM),
    )(*args)
    return res[0]


class SetCriterionATTPallas:
    """JAX/Pallas port of SetCriterionATT.forward."""

    def __init__(self, num_att_classes, weight_dict=None, losses=("att_labels",),
                 loss_type="bce", num_sample_cats=50):
        assert loss_type in ("bce", "focal")
        self.num_att_classes = num_att_classes
        self.weight_dict = weight_dict or {}
        self.losses = tuple(losses)
        self.loss_type = loss_type
        self.num_sample_cats = num_sample_cats
        # TODO(synk): load_class_freq(freq_weight=0.5) reads dataset class-frequency
        # statistics from disk; use uniform federated-loss weights instead.
        self.fed_loss_weight = np.ones((num_att_classes,), np.float32)

    # ---------------- host glue: target post-processing & fed-loss sampling -----
    def postprocess_att(self, targets):
        pos, neg = [], []
        for t in targets:
            boxes = np.asarray(t["boxes"])
            p = np.asarray(t["pos_att_classes"], np.float32)
            n = np.asarray(t["neg_att_classes"], np.float32)
            nb = boxes.shape[0]
            if nb > 0 and p.shape[0] == nb:
                pos.append(p)
                neg.append(n)
            if nb == 1 and p.shape[0] > nb:
                s = p.sum(axis=0, keepdims=True)
                pos.append(s)
                neg.append(s)  # faithful to the reference (neg also gets sum of pos)
            if nb > 1 and nb != p.shape[0]:
                # reference hard-codes 620 columns; parameterized to num_att_classes
                tmp = np.full((nb, self.num_att_classes), -1.0, np.float32)
                pos.append(tmp)
                neg.append(tmp)
        return np.concatenate(pos, axis=0), np.concatenate(neg, axis=0)

    def _get_fed_loss_inds(self, gt_classes, num_sample_cats, C):
        appeared = np.unique(gt_classes.astype(np.int64))
        n_target = min(num_sample_cats, C)
        if appeared.size < n_target:
            prob = self.fed_loss_weight.astype(np.float64).copy()
            prob[appeared] = 0.0
            # TODO(synk): torch.multinomial sampling replaced by a deterministic
            # top-weight pick of the remaining (non-appeared) classes.
            extra = np.argsort(-prob, kind="stable")[: n_target - appeared.size]
            appeared = np.concatenate([appeared, extra])
        return appeared

    def _prepare(self, outputs, targets):
        N, C = outputs.shape
        pos_labels, neg_labels = self.postprocess_att(targets)
        assert pos_labels.shape[0] == N
        assert neg_labels.shape[0] == N
        target_classes = (pos_labels == 1.0).astype(np.float32)   # [N, C] lane-dense
        if self.loss_type == "bce":
            pos_gt = np.unique(np.where(pos_labels == 1.0)[1])
            neg_gt = np.unique(np.where(neg_labels == 1.0)[1])
            inds = self._get_fed_loss_inds(
                np.concatenate([pos_gt, neg_gt]), self.num_sample_cats, C)
            ind_mask = np.zeros((1, C), np.float32)
            ind_mask[0, np.unique(inds)] = 1.0                     # [1, C] lane-dense
        else:
            ind_mask = None
        return target_classes, ind_mask

    # ---------------- losses -----------------------------------------------------
    def loss_att_labels(self, outputs, targets, log=True):
        target_classes, ind_mask = self._prepare(outputs, targets)
        logits = jnp.asarray(outputs, jnp.float32)                 # stays on device
        tgt = jnp.asarray(target_classes)
        mask = None if ind_mask is None else jnp.asarray(ind_mask)
        loss = _att_loss_device(logits, tgt, mask, loss_type=self.loss_type)
        return {"loss_att_ce": loss}

    def get_loss(self, loss, outputs, targets, **kwargs):
        loss_map = {"att_labels": self.loss_att_labels}
        return loss_map["att_labels"](outputs, targets, **kwargs)

    def __call__(self, outputs, targets):
        losses = {}
        for loss in self.losses:
            losses.update(self.get_loss(loss, outputs, targets))
        return losses


# ---------------- pure-numpy reference (float64) ------------------------------------
def _numpy_reference(logits, target_classes, ind_mask, loss_type):
    x = np.asarray(logits, np.float64)
    z = np.asarray(target_classes, np.float64)
    if loss_type == "bce":
        cols = np.where(np.asarray(ind_mask)[0] > 0)[0]
        xs, zs = x[:, cols], z[:, cols]
        bce = np.maximum(xs, 0.0) - xs * zs + np.log1p(np.exp(-np.abs(xs)))
        return bce.mean()
    p = 1.0 / (1.0 + np.exp(-x))
    pos = (z == 1.0).astype(np.float64)
    neg = (z < 1.0).astype(np.float64)
    pos_loss = (np.log(p) * (1.0 - p) ** 2 * pos).sum()
    neg_loss = (np.log(1.0 - p) * p ** 2 * neg).sum()
    num_pos = pos.sum()
    return -neg_loss if num_pos == 0 else -(pos_loss + neg_loss) / num_pos


if __name__ == "__main__":
    num_att_classes = 128   # original uses 620; small lane-aligned stand-in
    key = jax.random.PRNGKey(0)
    ks = jax.random.split(key, 8)

    def bern(k, p, shape):
        # np.array(...) makes a WRITABLE host copy (np.asarray of a jax array is read-only)
        return np.array(jax.random.bernoulli(k, p, shape), dtype=np.float32)

    # target 0: 3 boxes with per-box attribute labels           (branch 1 of postprocess_att)
    t0 = {"boxes": np.array(jax.random.uniform(ks[0], (3, 4)), np.float32),
          "pos_att_classes": bern(ks[1], 0.03, (3, num_att_classes)),
          "neg_att_classes": bern(ks[2], 0.03, (3, num_att_classes))}
    # target 1: 1 box but several attribute rows -> summed       (branch 2)
    t1 = {"boxes": np.array(jax.random.uniform(ks[3], (1, 4)), np.float32),
          "pos_att_classes": bern(ks[4], 0.05, (4, num_att_classes)),
          "neg_att_classes": bern(ks[4], 0.05, (4, num_att_classes))}
    # target 2: 2 boxes, mismatched label count -> rows of -1    (branch 3)
    t2 = {"boxes": np.array(jax.random.uniform(ks[5], (2, 4)), np.float32),
          "pos_att_classes": bern(ks[6], 0.05, (3, num_att_classes)),
          "neg_att_classes": bern(ks[6], 0.05, (3, num_att_classes))}
    targets = [t0, t1, t2]

    n_rows = 3 + 1 + 2   # rows produced by postprocess_att above
    src_logits = jax.random.normal(ks[7], (n_rows, num_att_classes), jnp.float32)

    for loss_type in ("bce", "focal"):
        crit = SetCriterionATTPallas(num_att_classes,
                                     weight_dict={"loss_att_ce": 1.0},
                                     losses=("att_labels",),
                                     loss_type=loss_type)
        losses = crit(src_logits, targets)
        val = np.asarray(jax.block_until_ready(losses["loss_att_ce"]))

        tgt_cls, ind_mask = crit._prepare(src_logits, targets)
        ref = _numpy_reference(np.asarray(src_logits), tgt_cls, ind_mask, loss_type)
        assert np.isfinite(val), f"non-finite loss for {loss_type}"
        np.testing.assert_allclose(val, ref, rtol=5e-3, atol=5e-3,
                                   err_msg=f"mismatch for loss_type={loss_type}")

    print("KERNEL_OK")
</pallas_src>

<mosaic_0001>
module attributes {stable_mosaic.version = 11 : i64} {
  func.func @kernel(%arg0: memref<6x128xf32, #tpu.memory_space<vmem>>, %arg1: memref<6x128xf32, #tpu.memory_space<vmem>>, %arg2: memref<1x128xf32, #tpu.memory_space<vmem>>, %arg3: memref<1xf32, #tpu.memory_space<smem>>) attributes {dimension_semantics = [], scalar_prefetch = 0 : i64, scratch_operands = 0 : i64, tpu.core_type = #tpu.core_type<tc>} {
    %c0 = arith.constant 0 : index
    %c0_0 = arith.constant 0 : index
    %0 = vector.load %arg0[%c0, %c0_0] : memref<6x128xf32, #tpu.memory_space<vmem>>, vector<6x128xf32>
    %c0_1 = arith.constant 0 : index
    %c0_2 = arith.constant 0 : index
    %1 = vector.load %arg1[%c0_1, %c0_2] : memref<6x128xf32, #tpu.memory_space<vmem>>, vector<6x128xf32>
    %c0_3 = arith.constant 0 : index
    %c0_4 = arith.constant 0 : index
    %2 = vector.load %arg2[%c0_3, %c0_4] : memref<1x128xf32, #tpu.memory_space<vmem>>, vector<1x128xf32>
    %3 = math.absf %0 : vector<6x128xf32>
    %cst = arith.constant 0.000000e+00 : f32
    %4 = vector.broadcast %cst : f32 to vector<6x128xf32>
    %5 = arith.subf %4, %3 : vector<6x128xf32>
    %6 = math.exp %5 : vector<6x128xf32>
    %cst_5 = arith.constant 0.000000e+00 : f32
    %7 = vector.broadcast %cst_5 : f32 to vector<6x128xf32>
    %8 = arith.maximumf %0, %7 : vector<6x128xf32>
    %9 = arith.mulf %0, %1 : vector<6x128xf32>
    %10 = arith.subf %8, %9 : vector<6x128xf32>
    %cst_6 = arith.constant 1.000000e+00 : f32
    %11 = vector.broadcast %cst_6 : f32 to vector<6x128xf32>
    %12 = arith.addf %11, %6 : vector<6x128xf32>
    %13 = math.log %12 : vector<6x128xf32>
    %14 = arith.addf %10, %13 : vector<6x128xf32>
    %15 = vector.broadcast %2 : vector<1x128xf32> to vector<6x128xf32>
    %16 = arith.mulf %14, %15 : vector<6x128xf32>
    %17 = vector.shape_cast %16 : vector<6x128xf32> to vector<1x6x128xf32>
    %cst_7 = arith.constant dense<0.000000e+00> : vector<1xf32>
    %18 = vector.multi_reduction <add>, %17, %cst_7 [1, 2] : vector<1x6x128xf32> to vector<1xf32>
    %19 = vector.shape_cast %18 : vector<1xf32> to vector<1x1x1xf32>
    %20 = vector.extract %19[0, 0, 0] : f32 from vector<1x1x1xf32>
    %21 = vector.shape_cast %2 : vector<1x128xf32> to vector<1x1x128xf32>
    %cst_8 = arith.constant dense<0.000000e+00> : vector<1xf32>
    %22 = vector.multi_reduction <add>, %21, %cst_8 [1, 2] : vector<1x1x128xf32> to vector<1xf32>
    %23 = vector.shape_cast %22 : vector<1xf32> to vector<1x1x1xf32>
    %24 = vector.extract %23[0, 0, 0] : f32 from vector<1x1x1xf32>
    %cst_9 = arith.constant 6.000000e+00 : f32
    %25 = arith.mulf %24, %cst_9 : f32
    %26 = arith.divf %20, %25 : f32
    %c0_10 = arith.constant 0 : index
    %27 = memref.load %arg3[%c0_10] : memref<1xf32, #tpu.memory_space<smem>>
    memref.store %26, %arg3[%c0_10] : memref<1xf32, #tpu.memory_space<smem>>
    return
  }
}

</mosaic_0001>

<bundles_post_ra>
// kernel: _att_loss_device.1
= control target key start
LH: loop header
LB: loop body
LE: loop exit
PB: predicated region body
PF: predicated region fallthrough
CT: control target
= control target key end

     0   :  { %8 = vsyncpa [#allocation3], 0  ;;  %s241_s0 = inlined_call_operand.hbm [shape: f32[6,128], index: 0, kind: input, shape index: {}]   ;;  %s242_s1 = inlined_call_operand.hbm [shape: f32[6,128], index: 1, kind: input, shape index: {}]   ;;  %s243_s2 = inlined_call_operand.vmem [shape: f32[1,128], index: 2, kind: input, shape index: {}]   ;;  %s244_s3 = inlined_call_operand.hbm [shape: f32[1], index: 3, kind: output, shape index: {}]  }
   0x1   :  { %9 = vsyncpa [#allocation6], 0 }
   0x2   :  { %10 = vsyncpa [#allocation4], 0  ;;  %s179_s12 = smov [#allocation2]   ;;  %s180_s14 = smov [#allocation5]  }
   0x3   :  { %s17_s13 = sshll.u32 %s179_s12, 4  ;;  %s27_s15 = sshll.u32 %s180_s14, 4  ;;  %s18_s13 = int_to_ptr.vmem [resolvable:$true] %s17_s13  ;;  %s28_s15 = int_to_ptr.vmem [resolvable:$true] %s27_s15 }
   0x4   :  { %s119_s18 = scalar_lea.hbm %s241_s0, 128 }
   0x5   :  { %p120_p0 = scmp.ne.s32.totalorder %s241_s0, %s119_s18  ;;  %p123_p1 = scmp.lt.u32.totalorder %s119_s18, %s241_s0 }
   0x7   :  { %p125_p2 = pnand %p123_p1, %p120_p0 }
   0x9   :  { %128 = shalt.err (!%p125_p2)
}
   0xa   :  { %s129_s23 = scalar_lea.vmem %s18_s13, 128  ;;  %p134_p4 = scmp.lt.s32.totalorder %s18_s13, %s18_s13 }
   0xb   :  { %p130_p3 = scmp.ne.s32.totalorder %s18_s13, %s129_s23  ;;  %p135_p5 = scmp.lt.s32.totalorder %s129_s23, %s129_s23 }
   0xd   :  { %p136_p6 = por %p135_p5, %p134_p4 }
   0xf   :  { %p137_p7 = pnand %p136_p6, %p130_p3 }
  0x11   :  { %140 = shalt.err (!%p137_p7)
}
  0x12   :  { %20 = dma.hbm_to_vmem [thread:$0]  %s241_s0, 128, %s18_s13, [#allocation3]  }
  0x13   :  { %s141_s28 = scalar_lea.hbm %s242_s1, 128 }
  0x14   :  { %p142_p8 = scmp.ne.s32.totalorder %s242_s1, %s141_s28  ;;  %p145_p9 = scmp.lt.u32.totalorder %s141_s28, %s242_s1 }
  0x16   :  { %p147_p10 = pnand %p145_p9, %p142_p8 }
  0x18   :  { %150 = shalt.err (!%p147_p10)
}
  0x19   :  { %s151_s6 = scalar_lea.vmem %s28_s15, 128  ;;  %p156_p12 = scmp.lt.s32.totalorder %s28_s15, %s28_s15 }
  0x1a   :  { %p152_p11 = scmp.ne.s32.totalorder %s28_s15, %s151_s6  ;;  %p157_p13 = scmp.lt.s32.totalorder %s151_s6, %s151_s6 }
  0x1c   :  { %p158_p0 = por %p157_p13, %p156_p12 }
  0x1e   :  { %p159_p1 = pnand %p158_p0, %p152_p11 }
  0x20   :  { %162 = shalt.err (!%p159_p1)
}
  0x21   :  { %30 = dma.hbm_to_vmem [thread:$0]  %s242_s1, 128, %s28_s15, [#allocation6]  }
  0x22   :  { %173 = dma.done.wait [#allocation3], 128  }
  0x23   :  { %174 = vsyncadd [#allocation3], 4294967168 }
  0x24   :  { %175 = dma.done.wait [#allocation6], 128  }
  0x25   :  { %176 = vsyncadd [#allocation6], 4294967168  ;;  %v39_v0 = vld [vmem:[#allocation2] sm:$0x3f]  ;;  %v54_v6 = vlaneseq  ;;  %v40_v7 = vld [vmem:[#allocation5] sm:$0x3f] }
  0x26   :  { %v42_v1 = vand.u32 2147483647, %v39_v0  ;;  %v46_v9 = vmax.f32 %v39_v0, 0.0  ;;  %v47_v10 = vmul.f32 %v40_v7, %v39_v0  ;;  %v41_v12 = vld [vmem:[%s243_s2] sm:$0x1]  ;;  %vm60_vm0 = vcmask 1045504  }
  0x27   :  { %v55_v8 = vshrl.u32 %v54_v6, 7  ;;  %vm71_vm1 = vcmask 1040384   ;;  %s163_s15 = scalar_lea.hbm %s244_s3, 16 }
  0x28   :  { %v43_v2 = vsub.f32 0.0, %v42_v1  ;;  %v48_v13 = vsub.f32 %v46_v9, %v47_v10  ;;  %v72_v20 = vsel %vm71_vm1, %v41_v12, 0.0  ;;  %p164_p2 = scmp.ne.s32.totalorder %s244_s3, %s163_s15  ;;  %p167_p3 = scmp.lt.u32.totalorder %s163_s15, %s244_s3 }
  0x29   :  { %v56_v11 = vsub.s32 0, %v55_v8 }
  0x2a   :  { %v44_v3 = vmul.f32 1.442695, %v43_v2  ;;  %p169_p4 = pnand %p167_p3, %p164_p2 }
  0x2b   :  { %v57_v16 = vrot.slane %v41_v12, %v56_v11 }
  0x2c   :  { %113 = vpow2.f32 %v44_v3 }
  0x36   :  { %v114_v4 = vpop.eup %113 }
  0x37   :  { %v49_v5 = vadd.f32 1.0, %v114_v4 }
  0x39   :  { %115 = vlog2.f32 %v49_v5 }
  0x43   :  { %v116_v14 = vpop.eup %115 }
  0x44   :  { %v51_v15 = vmul.f32 0.6931472, %v116_v14 }
  0x46   :  { %v52_v17 = vadd.f32 %v51_v15, %v48_v13 }
  0x48   :  { %v59_v18 = vmul.f32 %v57_v16, %v52_v17 }
  0x4a   :  { %v61_v19 = vsel %vm60_vm0, %v59_v18, 0.0 }
  0x4b   :  { %62 = vadd.xlane.f32.xlu0 %v61_v19 }
  0x4f   :  { %73 = vadd.xlane.f32.xlu0 %v72_v20 }
  0xd8   :  { %v63_v21 = vpop.xlane.xlu0 %62 }
  0xd9   :  { %v64_v22 = vrot.slane %v63_v21, 4 }
  0xdb   :  { %v65_v23 = vadd.f32 %v64_v22, %v63_v21 }
  0xdc   :  { %v74_v24 = vpop.xlane.xlu0 %73 }
  0xdd   :  { %v66_v25 = vrot.slane %v65_v23, 2  ;;  %v75_v26 = vrot.slane %v74_v24, 4 }
  0xdf   :  { %v76_v27 = vadd.f32 %v75_v26, %v74_v24  ;;  %v67_v28 = vadd.f32 %v66_v25, %v65_v23 }
  0xe1   :  { %v77_v29 = vrot.slane %v76_v27, 2  ;;  %v68_v30 = vrot.slane %v67_v28, 1 }
  0xe3   :  { %v78_v31 = vadd.f32 %v77_v29, %v76_v27  ;;  %v69_v32 = vadd.f32 %v68_v30, %v67_v28 }
  0xe5   :  { %104 = vpush %v69_v32  ;;  %v79_v33 = vrot.slane %v78_v31, 1 }
  0xe7   :  { %v80_v34 = vadd.f32 %v79_v33, %v78_v31 }
  0xe9   :  { %106 = vpush %v80_v34 }
 0x116   :  { %s105_s2 = spop %104 }
 0x11a   :  { %s107_s9 = spop %106 }
 0x11b   :  { %s82_s10 = smul.f32 6.0, %s107_s9 }
 0x11d   :  { %v83_v35 = vstv %s82_s10 }
 0x11e   :  { %117 = vrcp.f32 %v83_v35 }
 0x128   :  { %v118_v36 = vpop.eup %117 }
 0x129   :  { %108 = vpush %v118_v36 }
 0x15a   :  { %s109_s11 = spop %108 }
 0x15b   :  { %s86_s12 = smul.f32 %s109_s11, %s105_s2 }
 0x15d   :  { %88 = sst [smem:[#allocation7]] %s86_s12 }
 0x15e   :  { %172 = shalt.err (!%p169_p4)
}
 0x15f   :  { %s181_s20 = smov [#allocation7]  }
 0x160   :  { %96 = dma.smem_to_hbm %s181_s20, 16, %s244_s3, [#allocation4]  }
 0x161   :  { %177 = dma.done.wait [#allocation4], 16  }
 0x162   :  { %178 = vsyncadd [#allocation4], 4294967280 }
 0x163   :  { %100 = sfence }
 0x164   :  { %101 = vsyncpa [#allocation3], 1 }
 0x165   :  { %102 = vsyncpa [#allocation6], 1 }
 0x166   :  { %103 = vsyncpa [#allocation4], 1 }

</bundles_post_ra>
